<compile_context>
chip_gen: v7x
topology: tpu7x:2x2x1
jax: 0.10.0
libtpu: 0.0.40
codegen_flags: <defaults>
</compile_context>

<pallas_src>
import functools

import jax
import jax.numpy as jnp
from jax.experimental import pallas as pl
from jax.experimental.pallas import tpu as pltpu

# Module "parameters" (constructor scalars) — fixed deterministically in-script.
YLIMIT_LOSS_WEIGHT = 1.0
PERSPECTIVE_WEIGHT_LIMIT = 10.0   # None disables the clamp (torch.clamp(max=...))
BETA_TRAJ = 0.005                 # nn.SmoothL1Loss(reduction='none',  beta=0.005)
BETA_YLIM = 0.015                 # nn.SmoothL1Loss(reduction='mean',  beta=0.015)

_MAX_BLOCK_ROWS = 1024            # batch rows per grid step; keeps block VMEM << 32 MiB on v7x


def _smooth_l1(diff, beta):
    ad = jnp.abs(diff)
    return jnp.where(ad < beta, (0.5 / beta) * diff * diff, ad - 0.5 * beta)


def _loss_kernel(pred_ref, traj_ref, ylim_ref, out_ref, *, batch, anchors, block_rows):
    A = anchors
    TB = block_rows

    # Up-cast after load (no-op for f32 inputs, halves DMA bytes for bf16 inputs).
    pred = pred_ref[...].astype(jnp.float32)       # (TB, 2A+1) = [tp0 | tp1 | ylim_logit]
    traj = traj_ref[...].astype(jnp.float32)       # (TB, 2A)   = [tt0 | tt1]
    yt = ylim_ref[...].astype(jnp.float32)         # (TB, 1)

    # NOTE: for large A (>= ~64) the rail segments should be repacked to 128-lane-aligned
    # offsets to avoid XLU lane-rotates on the tp-tt subtracts; for tiny A the compact layout
    # is cheaper (less HBM traffic), so it is kept here.
    tp0 = pred[:, 0 * A:1 * A]
    tp1 = pred[:, 1 * A:2 * A]
    yp = pred[:, 2 * A:2 * A + 1]                  # (TB, 1) ylim logit
    tt0 = traj[:, 0 * A:1 * A]
    tt1 = traj[:, 1 * A:2 * A]

    # Valid-row mask: handles the partial last block when block_rows does not divide batch.
    row = pl.program_id(0) * TB + jax.lax.broadcasted_iota(jnp.int32, (TB, 1), 0)
    rvalid = row < batch                           # (TB, 1) bool

    # Unreduced SmoothL1 on the trajectory, summed over the two rails.
    se = _smooth_l1(tp0 - tt0, BETA_TRAJ) + _smooth_l1(tp1 - tt1, BETA_TRAJ)

    # Loss mask: anchor index <= ylim_target * (A - 1) (float comparison, as in torch),
    # restricted to valid batch rows so padded-row garbage never contributes.
    # (int32 iota + one convert kept instead of a float iota for lowering robustness; cost is
    #  a single VPU pass over (TB, A).)
    ylim_idx = yt * jnp.float32(A - 1)                                   # (TB, 1)
    rng = jax.lax.broadcasted_iota(jnp.int32, (TB, A), 1).astype(jnp.float32)
    in_mask = (rng <= ylim_idx) & rvalid                                 # (TB, A) bool

    # Perspective weighting: 1 / rail_width on the EUP (approx), clamped, applied only where
    # the mask is set — jnp.where selects keep 0*inf / NaN out of the row sums.
    rail_width = tt1 - tt0
    safe_width = jnp.where(in_mask, rail_width, 1.0)
    w = pl.reciprocal(safe_width, approx=True)
    if PERSPECTIVE_WEIGHT_LIMIT is not None:
        w = jnp.minimum(w, jnp.float32(PERSPECTIVE_WEIGHT_LIMIT))

    num = jnp.sum(jnp.where(in_mask, se * w, 0.0), axis=1, keepdims=True)   # (TB, 1)
    den = jnp.sum(in_mask.astype(jnp.float32), axis=1, keepdims=True)       # (TB, 1)
    # Exact divide: den is a narrow column, so this costs ~nothing and keeps the per-row
    # trajectory loss at full f32 accuracy (only the wide rail-width reciprocal is approx).
    traj_loss = num / jnp.where(den > 0.0, den, 1.0)
    traj_loss = jnp.where(rvalid & (yt != 0.0), traj_loss, 0.0)             # traj_loss[ylim==0]=0

    # ylim head: SmoothL1(sigmoid(logit), target); manual sigmoid (exp + exact divide), padded
    # rows masked out.
    sig = 1.0 / (1.0 + jnp.exp(-yp))
    yl = _smooth_l1(sig - yt, BETA_YLIM)
    yl = jnp.where(rvalid, yl, 0.0)

    # Single fused epilogue reduction -> one scalar per block; written as one lane-dense
    # (8, 128) f32 vreg (unmasked vst). The wrapper reads [0, 0] of each block and scales by 1/B.
    partial = jnp.sum(traj_loss + jnp.float32(YLIMIT_LOSS_WEIGHT) * yl)
    out_ref[...] = jnp.broadcast_to(partial, (1, 8, 128))


@functools.partial(jax.jit, static_argnames=("block_rows",))
def train_ego_path_regression_loss(prediction, traj_target, ylim_target, *, block_rows=None):
    """prediction: (B, 2*A + 1); traj_target: (B, 2, A); ylim_target: (B,)."""
    B, two, A = traj_target.shape
    assert two == 2
    W = 2 * A + 1
    assert prediction.shape == (B, W)

    # Free (bitcast) reshapes only — no concat / pad / extra HBM round-trip in the wrapper.
    traj2d = traj_target.reshape(B, 2 * A)         # [tt0 | tt1]
    ylim2d = ylim_target.reshape(B, 1)

    max_rows = _MAX_BLOCK_ROWS if block_rows is None else int(block_rows)
    if B <= max_rows:
        tb = B                                     # single block; full-dim satisfies sublane rule
    else:
        tb = max(8, (max_rows // 8) * 8)           # sublane-aligned batch blocks
    nb = -(-B // tb)                               # ceil(B / tb); last block masked in-kernel

    kernel = functools.partial(_loss_kernel, batch=B, anchors=A, block_rows=tb)

    nbytes = lambda x: x.size * x.dtype.itemsize
    cost = pl.CostEstimate(
        flops=30 * B * A + 10 * B,
        transcendentals=B * (A + 2),
        bytes_accessed=nbytes(prediction) + nbytes(traj_target) + nbytes(ylim_target)
        + nb * 8 * 128 * 4,
    )

    partials = pl.pallas_call(
        kernel,
        out_shape=jax.ShapeDtypeStruct((nb, 8, 128), jnp.float32),
        grid=(nb,),
        in_specs=[
            pl.BlockSpec((tb, W), lambda i: (i, 0)),
            pl.BlockSpec((tb, 2 * A), lambda i: (i, 0)),
            pl.BlockSpec((tb, 1), lambda i: (i, 0)),
        ],
        out_specs=pl.BlockSpec((1, 8, 128), lambda i: (i, 0, 0)),
        compiler_params=pltpu.CompilerParams(
            dimension_semantics=("parallel",),     # shards batch blocks across both TCs on v7x
            vmem_limit_bytes=32 * 1024 * 1024,
        ),
        cost_estimate=cost,
    )(prediction, traj2d, ylim2d)

    # Tiny XLA epilogue: nb partial sums + one compile-time 1/B multiply.
    return jnp.sum(partials[:, 0, 0]) * jnp.float32(1.0 / B)


def _reference_loss(prediction, traj_target, ylim_target):
    """Pure-JAX mirror of the PyTorch forward (exact divides), used only for verification."""
    B, two, A = traj_target.shape
    traj_pred = prediction[:, :-1].reshape(B, two, A)
    ylim_pred = prediction[:, -1]

    traj_se = _smooth_l1(traj_pred - traj_target, BETA_TRAJ)
    ylim_idx = ylim_target * (A - 1)
    rng = jnp.arange(A, dtype=jnp.float32)[None, :].repeat(B, axis=0)
    loss_mask = (rng <= ylim_idx[:, None]).astype(jnp.float32)
    rail_width = traj_target[:, 1, :] - traj_target[:, 0, :]
    weights = loss_mask / rail_width
    if PERSPECTIVE_WEIGHT_LIMIT is not None:
        weights = jnp.minimum(weights, PERSPECTIVE_WEIGHT_LIMIT)
    weights = weights[:, None, :]
    traj_loss = jnp.sum(traj_se * weights, axis=(1, 2)) / jnp.sum(loss_mask, axis=1)
    traj_loss = jnp.where(ylim_target == 0.0, 0.0, traj_loss)
    traj_loss = jnp.mean(traj_loss)

    ylim_loss = jnp.mean(_smooth_l1(jax.nn.sigmoid(ylim_pred) - ylim_target, BETA_YLIM))
    return traj_loss + YLIMIT_LOSS_WEIGHT * ylim_loss


if __name__ == "__main__":
    def make_inputs(key, B, A):
        k1, k2, k3, k4 = jax.random.split(key, 4)
        # Targets: two rails with strictly positive rail width, ylim in (0.3, 1.0).
        traj0 = 0.2 + 0.2 * jax.random.uniform(k1, (B, A), dtype=jnp.float32)
        traj1 = traj0 + 0.1 + 0.2 * jax.random.uniform(k2, (B, A), dtype=jnp.float32)
        traj_target = jnp.stack([traj0, traj1], axis=1)                  # (B, 2, A)
        ylim_target = 0.3 + 0.7 * jax.random.uniform(k3, (B,), dtype=jnp.float32)
        # Prediction: noisy trajectory + a ylim logit, flattened to (B, 2*A + 1).
        noise = 0.02 * jax.random.normal(k4, (B, 2 * A + 1), dtype=jnp.float32)
        flat_traj = traj_target.reshape(B, 2 * A)
        prediction = jnp.concatenate(
            [flat_traj, jnp.zeros((B, 1), dtype=jnp.float32)], axis=1) + noise
        return prediction, traj_target, ylim_target

    k_case1, k_case2 = jax.random.split(jax.random.PRNGKey(0))

    # Case 1: tiny batch -> single block (block shape == full array, no row padding).
    p1, t1, y1 = make_inputs(k_case1, B=4, A=8)
    loss1 = jax.block_until_ready(train_ego_path_regression_loss(p1, t1, y1))
    ref1 = _reference_loss(p1, t1, y1)
    assert jnp.isfinite(loss1), "kernel produced non-finite loss (case 1)"
    assert abs(float(loss1) - float(ref1)) < 5e-3 * max(1.0, abs(float(ref1))), (
        float(loss1), float(ref1))

    # Case 2: gridded path with a partial last block (20 rows, 8-row blocks -> 3 parallel steps).
    p2, t2, y2 = make_inputs(k_case2, B=20, A=8)
    loss2 = jax.block_until_ready(train_ego_path_regression_loss(p2, t2, y2, block_rows=8))
    ref2 = _reference_loss(p2, t2, y2)
    assert jnp.isfinite(loss2), "kernel produced non-finite loss (case 2)"
    assert abs(float(loss2) - float(ref2)) < 5e-3 * max(1.0, abs(float(ref2))), (
        float(loss2), float(ref2))

    print("KERNEL_OK")
</pallas_src>

<mosaic_0001>
module attributes {stable_mosaic.version = 11 : i64} {
  func.func @_loss_kernel(%arg0: i32, %arg1: memref<4x17xf32, #tpu.memory_space<vmem>>, %arg2: memref<4x16xf32, #tpu.memory_space<vmem>>, %arg3: memref<4x1xf32, #tpu.memory_space<vmem>>, %arg4: memref<1x8x128xf32, #tpu.memory_space<vmem>>) attributes {dimension_semantics = [#tpu.dimension_semantics<parallel>], iteration_bounds = array<i64: 1>, scalar_prefetch = 0 : i64, scratch_operands = 0 : i64, tpu.core_type = #tpu.core_type<tc>, window_params = [{transform_indices = @transform_0, window_bounds = array<i64: 4, 17>}, {transform_indices = @transform_1, window_bounds = array<i64: 4, 16>}, {transform_indices = @transform_2, window_bounds = array<i64: 4, 1>}, {transform_indices = @transform_3, window_bounds = array<i64: 1, 8, 128>}]} {
    %c0 = arith.constant 0 : index
    %c0_0 = arith.constant 0 : index
    %0 = vector.load %arg1[%c0, %c0_0] : memref<4x17xf32, #tpu.memory_space<vmem>>, vector<4x17xf32>
    %c0_1 = arith.constant 0 : index
    %c0_2 = arith.constant 0 : index
    %1 = vector.load %arg2[%c0_1, %c0_2] : memref<4x16xf32, #tpu.memory_space<vmem>>, vector<4x16xf32>
    %c0_3 = arith.constant 0 : index
    %c0_4 = arith.constant 0 : index
    %2 = vector.load %arg3[%c0_3, %c0_4] : memref<4x1xf32, #tpu.memory_space<vmem>>, vector<4x1xf32>
    %3 = vector.extract_strided_slice %0 {offsets = [0, 0], sizes = [4, 8], strides = [1, 1]} : vector<4x17xf32> to vector<4x8xf32>
    %4 = vector.extract_strided_slice %0 {offsets = [0, 8], sizes = [4, 8], strides = [1, 1]} : vector<4x17xf32> to vector<4x8xf32>
    %5 = vector.extract_strided_slice %0 {offsets = [0, 16], sizes = [4, 1], strides = [1, 1]} : vector<4x17xf32> to vector<4x1xf32>
    %6 = vector.extract_strided_slice %1 {offsets = [0, 0], sizes = [4, 8], strides = [1, 1]} : vector<4x16xf32> to vector<4x8xf32>
    %7 = vector.extract_strided_slice %1 {offsets = [0, 8], sizes = [4, 8], strides = [1, 1]} : vector<4x16xf32> to vector<4x8xf32>
    %c4_i32 = arith.constant 4 : i32
    %8 = arith.muli %arg0, %c4_i32 : i32
    %9 = tpu.iota {dimensions = array<i32: 0>} : vector<4x1xi32>
    %10 = vector.broadcast %8 : i32 to vector<4x1xi32>
    %11 = arith.addi %10, %9 : vector<4x1xi32>
    %c4_i32_5 = arith.constant 4 : i32
    %12 = vector.broadcast %c4_i32_5 : i32 to vector<4x1xi32>
    %13 = arith.cmpi slt, %11, %12 : vector<4x1xi32>
    %14 = arith.subf %3, %6 : vector<4x8xf32>
    %15 = math.absf %14 : vector<4x8xf32>
    %cst = arith.constant 5.000000e-03 : f32
    %16 = vector.broadcast %cst : f32 to vector<4x8xf32>
    %17 = arith.cmpf olt, %15, %16 : vector<4x8xf32>
    %cst_6 = arith.constant 1.000000e+02 : f32
    %18 = vector.broadcast %cst_6 : f32 to vector<4x8xf32>
    %19 = arith.mulf %18, %14 : vector<4x8xf32>
    %20 = arith.mulf %19, %14 : vector<4x8xf32>
    %cst_7 = arith.constant 2.500000e-03 : f32
    %21 = vector.broadcast %cst_7 : f32 to vector<4x8xf32>
    %22 = arith.subf %15, %21 : vector<4x8xf32>
    %23 = arith.select %17, %20, %22 : vector<4x8xi1>, vector<4x8xf32>
    %24 = arith.subf %4, %7 : vector<4x8xf32>
    %25 = math.absf %24 : vector<4x8xf32>
    %cst_8 = arith.constant 5.000000e-03 : f32
    %26 = vector.broadcast %cst_8 : f32 to vector<4x8xf32>
    %27 = arith.cmpf olt, %25, %26 : vector<4x8xf32>
    %cst_9 = arith.constant 1.000000e+02 : f32
    %28 = vector.broadcast %cst_9 : f32 to vector<4x8xf32>
    %29 = arith.mulf %28, %24 : vector<4x8xf32>
    %30 = arith.mulf %29, %24 : vector<4x8xf32>
    %cst_10 = arith.constant 2.500000e-03 : f32
    %31 = vector.broadcast %cst_10 : f32 to vector<4x8xf32>
    %32 = arith.subf %25, %31 : vector<4x8xf32>
    %33 = arith.select %27, %30, %32 : vector<4x8xi1>, vector<4x8xf32>
    %34 = arith.addf %23, %33 : vector<4x8xf32>
    %cst_11 = arith.constant 7.000000e+00 : f32
    %35 = vector.broadcast %cst_11 : f32 to vector<4x1xf32>
    %36 = arith.mulf %2, %35 : vector<4x1xf32>
    %37 = tpu.iota {dimensions = array<i32: 1>} : vector<4x8xi32>
    %38 = arith.sitofp %37 : vector<4x8xi32> to vector<4x8xf32>
    %39 = vector.broadcast %36 : vector<4x1xf32> to vector<4x8xf32>
    %40 = arith.cmpf ole, %38, %39 : vector<4x8xf32>
    %41 = vector.broadcast %13 : vector<4x1xi1> to vector<4x8xi1>
    %42 = arith.andi %40, %41 : vector<4x8xi1>
    %43 = arith.subf %7, %6 : vector<4x8xf32>
    %cst_12 = arith.constant 1.000000e+00 : f32
    %44 = vector.broadcast %cst_12 : f32 to vector<4x8xf32>
    %45 = arith.select %42, %43, %44 : vector<4x8xi1>, vector<4x8xf32>
    %46 = tpu.reciprocal %45 {approx = true} : vector<4x8xf32> -> vector<4x8xf32>
    %cst_13 = arith.constant 1.000000e+01 : f32
    %47 = vector.broadcast %cst_13 : f32 to vector<4x8xf32>
    %48 = arith.minimumf %46, %47 : vector<4x8xf32>
    %49 = arith.mulf %34, %48 : vector<4x8xf32>
    %cst_14 = arith.constant 0.000000e+00 : f32
    %50 = vector.broadcast %cst_14 : f32 to vector<4x8xf32>
    %51 = arith.select %42, %49, %50 : vector<4x8xi1>, vector<4x8xf32>
    %cst_15 = arith.constant dense<0.000000e+00> : vector<4xf32>
    %52 = vector.multi_reduction <add>, %51, %cst_15 [1] : vector<4x8xf32> to vector<4xf32>
    %53 = vector.shape_cast %52 : vector<4xf32> to vector<4x1xf32>
    %54 = arith.extui %42 : vector<4x8xi1> to vector<4x8xi32>
    %55 = arith.sitofp %54 : vector<4x8xi32> to vector<4x8xf32>
    %cst_16 = arith.constant dense<0.000000e+00> : vector<4xf32>
    %56 = vector.multi_reduction <add>, %55, %cst_16 [1] : vector<4x8xf32> to vector<4xf32>
    %57 = vector.shape_cast %56 : vector<4xf32> to vector<4x1xf32>
    %cst_17 = arith.constant 0.000000e+00 : f32
    %58 = vector.broadcast %cst_17 : f32 to vector<4x1xf32>
    %59 = arith.cmpf ogt, %57, %58 : vector<4x1xf32>
    %cst_18 = arith.constant 1.000000e+00 : f32
    %60 = vector.broadcast %cst_18 : f32 to vector<4x1xf32>
    %61 = arith.select %59, %57, %60 : vector<4x1xi1>, vector<4x1xf32>
    %62 = arith.divf %53, %61 : vector<4x1xf32>
    %cst_19 = arith.constant 0.000000e+00 : f32
    %63 = vector.broadcast %cst_19 : f32 to vector<4x1xf32>
    %64 = arith.cmpf one, %2, %63 : vector<4x1xf32>
    %65 = arith.andi %13, %64 : vector<4x1xi1>
    %cst_20 = arith.constant 0.000000e+00 : f32
    %66 = vector.broadcast %cst_20 : f32 to vector<4x1xf32>
    %67 = arith.select %65, %62, %66 : vector<4x1xi1>, vector<4x1xf32>
    %cst_21 = arith.constant 0.000000e+00 : f32
    %68 = vector.broadcast %cst_21 : f32 to vector<4x1xf32>
    %69 = arith.subf %68, %5 : vector<4x1xf32>
    %70 = math.exp %69 : vector<4x1xf32>
    %cst_22 = arith.constant 1.000000e+00 : f32
    %71 = vector.broadcast %cst_22 : f32 to vector<4x1xf32>
    %72 = arith.addf %71, %70 : vector<4x1xf32>
    %cst_23 = arith.constant 1.000000e+00 : f32
    %73 = vector.broadcast %cst_23 : f32 to vector<4x1xf32>
    %74 = arith.divf %73, %72 : vector<4x1xf32>
    %75 = arith.subf %74, %2 : vector<4x1xf32>
    %76 = math.absf %75 : vector<4x1xf32>
    %cst_24 = arith.constant 1.500000e-02 : f32
    %77 = vector.broadcast %cst_24 : f32 to vector<4x1xf32>
    %78 = arith.cmpf olt, %76, %77 : vector<4x1xf32>
    %cst_25 = arith.constant 33.3333321 : f32
    %79 = vector.broadcast %cst_25 : f32 to vector<4x1xf32>
    %80 = arith.mulf %79, %75 : vector<4x1xf32>
    %81 = arith.mulf %80, %75 : vector<4x1xf32>
    %cst_26 = arith.constant 7.500000e-03 : f32
    %82 = vector.broadcast %cst_26 : f32 to vector<4x1xf32>
    %83 = arith.subf %76, %82 : vector<4x1xf32>
    %84 = arith.select %78, %81, %83 : vector<4x1xi1>, vector<4x1xf32>
    %cst_27 = arith.constant 0.000000e+00 : f32
    %85 = vector.broadcast %cst_27 : f32 to vector<4x1xf32>
    %86 = arith.select %13, %84, %85 : vector<4x1xi1>, vector<4x1xf32>
    %cst_28 = arith.constant 1.000000e+00 : f32
    %87 = vector.broadcast %cst_28 : f32 to vector<4x1xf32>
    %88 = arith.mulf %87, %86 : vector<4x1xf32>
    %89 = arith.addf %67, %88 : vector<4x1xf32>
    %90 = vector.shape_cast %89 : vector<4x1xf32> to vector<1x4x1xf32>
    %cst_29 = arith.constant dense<0.000000e+00> : vector<1xf32>
    %91 = vector.multi_reduction <add>, %90, %cst_29 [1, 2] : vector<1x4x1xf32> to vector<1xf32>
    %92 = vector.shape_cast %91 : vector<1xf32> to vector<1x1x1xf32>
    %93 = vector.extract %92[0, 0, 0] : f32 from vector<1x1x1xf32>
    %94 = vector.broadcast %93 : f32 to vector<1x8x128xf32>
    %c0_30 = arith.constant 0 : index
    %c0_31 = arith.constant 0 : index
    %c0_32 = arith.constant 0 : index
    %95 = vector.load %arg4[%c0_30, %c0_31, %c0_32] : memref<1x8x128xf32, #tpu.memory_space<vmem>>, vector<1x8x128xf32>
    tpu.vector_store %arg4[%c0_30, %c0_31, %c0_32], %94 {strides = array<i32>} : memref<1x8x128xf32, #tpu.memory_space<vmem>>, vector<1x8x128xf32>,
    return
  }
  func.func @transform_0(%arg0: i32) -> (i32, i32) {
    %c0_i32 = arith.constant 0 : i32
    %c0_i32_0 = arith.constant 0 : i32
    return %arg0, %c0_i32 : i32, i32
  }
  func.func @transform_1(%arg0: i32) -> (i32, i32) {
    %c0_i32 = arith.constant 0 : i32
    %c0_i32_0 = arith.constant 0 : i32
    return %arg0, %c0_i32 : i32, i32
  }
  func.func @transform_2(%arg0: i32) -> (i32, i32) {
    %c0_i32 = arith.constant 0 : i32
    %c0_i32_0 = arith.constant 0 : i32
    return %arg0, %c0_i32 : i32, i32
  }
  func.func @transform_3(%arg0: i32) -> (i32, i32, i32) {
    %c0_i32 = arith.constant 0 : i32
    %c0_i32_0 = arith.constant 0 : i32
    %c0_i32_1 = arith.constant 0 : i32
    return %arg0, %c0_i32, %c0_i32_0 : i32, i32, i32
  }
}

</mosaic_0001>

<bundles_post_ra>
// kernel: train_ego_path_regression_loss.1
= control target key start
LH: loop header
LB: loop body
LE: loop exit
PB: predicated region body
PF: predicated region fallthrough
CT: control target
= control target key end

     0   :  { %v138_v1 = vmov 0   ;;  %s139_s16 = smov 8   ;;  %v18_v13 = vlaneseq  ;;  %vm62_vm3 = vcmask 60416   ;;  %v142_v19 = vmov 0.0   ;;  %s196_s1 = inlined_call_operand.vmem [shape: f32[4,16], index: 1, kind: input, shape index: {}]   ;;  %s197_s2 = inlined_call_operand.vmem [shape: f32[4,1], index: 2, kind: input, shape index: {}]   ;;  %s198_s0 = inlined_call_operand.vmem [shape: f32[4,17], index: 0, kind: input, shape index: {}]   ;;  %s199_s3 = inlined_call_operand.vmem [shape: f32[1,8,128], index: 3, kind: output, shape index: {}]  }
   0x1   :  { %v15_v0 = vld [vmem:[%s196_s1] sm:$0xf]  ;;  %129 = vset.pattern.permute.xlu0 %v138_v1  ;;  %s140_s1 = smov 120   ;;  %vm101_vm9 = vcmask 3072  }
   0x2   :  { %v170_v2 = vld [vmem:[%s197_s2] sm:$0xf]  ;;  %49 = vrot.lane.b32.xlu0 %v15_v0, %s139_s16  ;;  %v37_v14 = vand.u32 127, %v18_v13  ;;  %s141_s2 = smov 16   ;;  %v19_v15 = vshrl.u32 %v18_v13, 7 }
   0x3   :  { %v35_v3 = vmul.f32 7.0, %v170_v2  ;;  %v14_v4 = vld [vmem:[%s198_s0] sm:$0xf]  ;;  %s143_s0 = smov 112   ;;  %vm75_vm7 = vcmp.ne.f32.partialorder %v170_v2, 0.0 }
   0x4   :  { %v23_v5 = vsub.f32 %v14_v4, %v15_v0  ;;  %v38_v16 = vcvt.s32.f32 %v37_v14  ;;  %vm22_vm1 = vcmp.lt.s32.totalorder %v19_v15, 4  ;;  %v78_v22 = vsub.f32 0.0, %v14_v4 }
   0x5   :  { %vm76_vm8 = vmand %vm22_vm1, %vm75_vm7 }
   0x6   :  { %41 = vperm.xlu0 %129, %v35_v3   ;;  %v24_v6 = vand.u32 2147483647, %v23_v5  ;;  %v26_v7 = vmul.f32 100.0, %v23_v5  ;;  %v79_v23 = vmul.f32 1.442695, %v78_v22 }
   0x8   :  { %v27_v9 = vmul.f32 %v26_v7, %v23_v5  ;;  %v118_v10 = vadd.f32 -0.0025, %v24_v6  ;;  %vm25_vm0 = vcmp.lt.f32.partialorder %v24_v6, 0.005  ;;  %130 = vpow2.f32 %v79_v23 }
   0xa   :  { %v29_v12 = vsel %vm25_vm0, %v27_v9, %v118_v10 }
  0x12   :  { %v131_v24 = vpop.eup %130 }
  0x13   :  { %v81_v25 = vadd.f32 1.0, %v131_v24 }
  0x15   :  { %132 = vrcp.f32 %v81_v25 }
  0x1f   :  { %v133_v29 = vpop.eup %132 }
  0x74   :  { %v50_v8 = vpop.permute.xlu0 %49 }
  0x75   :  { %v52_v11 = vsub.f32 %v15_v0, %v50_v8 }
  0x77   :  { %54 = vrot.lane.b32.xlu1 %v52_v11, %s140_s1 }
  0x7b   :  { %31 = vrot.lane.b32.xlu1 %v29_v12, %s140_s1 }
  0x7f   :  { %85 = vrot.lane.b32.xlu1 %v170_v2, %s141_s2 }
  0x85   :  { %v42_v17 = vpop.permute.xlu0 %41 }
  0x86   :  { %vm44_vm2 = vcmp.le.f32.partialorder %v38_v16, %v42_v17 }
  0x87   :  { %vm178_vm4 = vmand %vm44_vm2, %vm22_vm1 }
  0x88   :  { %v119_v20 = vsel %vm178_vm4, 1.0, %v142_v19 }
  0x89   :  { %v68_v21 = vsel %vm62_vm3, %v119_v20, 0.0 }
  0x8a   :  { %69 = vadd.xlane.f32.xlu0 %v68_v21 }
  0xe9   :  { %v55_v26 = vpop.permute.xlu1 %54 }
  0xea   :  { %v57_v27 = vsel %vm178_vm4, %v55_v26, 1.0 }
  0xeb   :  { %134 = vrcp.f32 %v57_v27 }
  0xed   :  { %v32_v28 = vpop.permute.xlu1 %31 }
  0xee   :  { %v34_v32 = vadd.f32 %v32_v28, %v29_v12 }
  0xf1   :  { %v86_v30 = vpop.permute.xlu1 %85 }
  0xf2   :  { %v88_v31 = vsub.f32 %v133_v29, %v86_v30 }
  0xf4   :  { %v89_v33 = vand.u32 2147483647, %v88_v31  ;;  %v91_v34 = vmul.f32 33.333332, %v88_v31 }
  0xf5   :  { %v135_v35 = vpop.eup %134 }
  0xf6   :  { %v59_v36 = vmin.f32 %v135_v35, 10.0  ;;  %v92_v37 = vmul.f32 %v91_v34, %v88_v31  ;;  %v120_v38 = vadd.f32 -0.0075, %v89_v33  ;;  %vm90_vm5 = vcmp.lt.f32.partialorder %v89_v33, 0.015 }
  0xf8   :  { %v60_v39 = vmul.f32 %v59_v36, %v34_v32  ;;  %v94_v40 = vsel %vm90_vm5, %v92_v37, %v120_v38 }
  0xf9   :  { %v95_v41 = vsel %vm22_vm1, %v94_v40, 0.0 }
  0xfa   :  { %v61_v42 = vsel %vm178_vm4, %v60_v39, 0.0  ;;  %97 = vrot.lane.b32.xlu0 %v95_v41, %s143_s0 }
  0xfb   :  { %v63_v43 = vsel %vm62_vm3, %v61_v42, 0.0 }
  0xfc   :  { %64 = vadd.xlane.f32.xlu1 %v63_v43 }
 0x117   :  { %v70_v44 = vpop.xlane.xlu0 %69 }
 0x118   :  { %vm71_vm6 = vcmp.gt.f32.partialorder %v70_v44, 0.0 }
 0x119   :  { %v72_v45 = vsel %vm71_vm6, %v70_v44, 1.0 }
 0x11a   :  { %136 = vrcp.f32 %v72_v45 }
 0x124   :  { %v137_v46 = vpop.eup %136 }
 0x16c   :  { %v98_v49 = vpop.permute.xlu0 %97 }
 0x189   :  { %v65_v47 = vpop.xlane.xlu1 %64 }
 0x18a   :  { %v74_v48 = vmul.f32 %v137_v46, %v65_v47 }
 0x18c   :  { %v77_v50 = vsel %vm76_vm8, %v74_v48, 0.0 }
 0x18d   :  { %v100_v51 = vadd.f32 %v98_v49, %v77_v50 }
 0x18f   :  { %v102_v52 = vsel %vm101_vm9, %v100_v51, 0.0 }
 0x190   :  { %103 = vadd.xlane.f32.xlu1 %v102_v52 }
 0x21d   :  { %v104_v53 = vpop.xlane.xlu1 %103 }
 0x21e   :  { %v105_v54 = vrot.slane %v104_v53, 4 }
 0x220   :  { %v106_v55 = vadd.f32 %v105_v54, %v104_v53 }
 0x222   :  { %v107_v56 = vrot.slane %v106_v55, 2 }
 0x224   :  { %v108_v57 = vadd.f32 %v107_v56, %v106_v55 }
 0x226   :  { %v109_v58 = vrot.slane %v108_v57, 1 }
 0x228   :  { %v110_v59 = vadd.f32 %v109_v58, %v108_v57 }
 0x22a   :  { %121 = vpush %v110_v59 }
 0x25b   :  { %s122_s19 = spop %121 }
 0x25c   :  { %v112_v60 = vstv %s122_s19 }
 0x25d   :  { %113 = vst [vmem:[%s199_s3] sm:$0xff] %v112_v60 }

</bundles_post_ra>
